<compile_context>
chip_gen: v5e
topology: v5e:2x2
jax: 0.10.0
libtpu: 0.0.40
codegen_flags: <defaults>
</compile_context>

<pallas_src>
import jax
import jax.numpy as jnp
from jax import lax
from jax.experimental import pallas as pl
from jax.experimental.pallas import tpu as pltpu


def _round_up(n: int, m: int) -> int:
    return ((n + m - 1) // m) * m


def _make_mlp_kernel(num_layers: int, n_out_real: int):
    """Kernel ref order: (x, w0, b0, w1, b1, ..., w{L-1}, b{L-1}, out).

    x tile:   (TILE_B, in_pad)        f32  (cast to bf16 for the MXU)
    w_i:      (in_pad_i, out_pad_i)   bf16 (VMEM-resident across the grid)
    b_i:      (1, out_pad_i)          f32
    out tile: (TILE_B, out_pad_last)  f32 softmax probabilities (padded lanes ~ 0)
    """

    def kernel(*refs):
        x_ref = refs[0]
        out_ref = refs[-1]

        # bf16 operands -> 2x MXU throughput; accumulate in f32.
        h = x_ref[...].astype(jnp.bfloat16)
        logits = None
        for i in range(num_layers):
            w = refs[1 + 2 * i][...]                  # bf16 (in_pad, out_pad)
            b = refs[2 + 2 * i][...]                  # f32  (1, out_pad)
            acc = jnp.dot(h, w, preferred_element_type=jnp.float32) + b
            if i < num_layers - 1:
                h = jnp.maximum(acc, 0.0).astype(jnp.bfloat16)   # ReLU, back to bf16
            else:
                logits = acc                                      # keep f32 for softmax

        # Padded output lanes must not contribute to the softmax denominator.
        col = lax.broadcasted_iota(jnp.int32, logits.shape, dimension=1)
        logits = jnp.where(col < n_out_real, logits, -jnp.inf)

        # Softmax over dim=1 (feature axis), f32 math.
        m = jnp.max(logits, axis=-1, keepdims=True)
        e = jnp.exp(logits - m)                       # exp(-inf) == 0 on padded lanes
        denom = jnp.sum(e, axis=-1, keepdims=True)
        out_ref[...] = (e * pl.reciprocal(denom, approx=True)).astype(out_ref.dtype)

    return kernel


def variable_network_forward(x, weights, biases, *, tile_b=None, interpret=False):
    """Runs the VariableNetwork forward pass as a single batch-tiled Pallas call.

    x:       (batch, layers[0])           float32
    weights: list of (layers[i], layers[i+1]) float32 (already transposed for x @ W)
    biases:  list of (1, layers[i+1]) (or (layers[i+1],)) float32
    returns: (batch, layers[-1]) float32 softmax probabilities
    """
    num_layers = len(weights)
    batch, n_in = x.shape
    n_out = weights[-1].shape[1]

    # ---- pad all feature dims to 128 lanes (lane-dense loads/stores, unmasked MXU) ----
    dims = [n_in] + [w.shape[1] for w in weights]
    dims_pad = [_round_up(d, 128) for d in dims]

    # ---- batch tile: multiple of 8 sublanes, capped to keep vreg / VMEM pressure sane ----
    if tile_b is None:
        tile_b = min(256, _round_up(batch, 8))
    tile_b = max(8, _round_up(tile_b, 8))
    batch_pad = _round_up(batch, tile_b)

    # ---- pad & cast parameters (zero padding is exact: contributes 0 in f32 accumulation) ----
    x_pad = jnp.zeros((batch_pad, dims_pad[0]), jnp.float32).at[:batch, :n_in].set(x)
    w_pad, b_pad = [], []
    for i, (w, b) in enumerate(zip(weights, biases)):
        b2 = jnp.reshape(b, (1, -1)).astype(jnp.float32)
        wp = jnp.zeros((dims_pad[i], dims_pad[i + 1]), jnp.float32)
        wp = wp.at[: dims[i], : dims[i + 1]].set(w.astype(jnp.float32))
        bp = jnp.zeros((1, dims_pad[i + 1]), jnp.float32).at[:, : dims[i + 1]].set(b2)
        w_pad.append(wp.astype(jnp.bfloat16))   # halves resident VMEM, 2x MXU throughput
        b_pad.append(bp)                        # bias add stays in f32

    grid = (batch_pad // tile_b,)

    in_specs = [pl.BlockSpec((tile_b, dims_pad[0]), lambda i: (i, 0))]
    args = [x_pad]
    for wp, bp in zip(w_pad, b_pad):
        in_specs.append(pl.BlockSpec(wp.shape, lambda i: (0, 0)))   # weights: VMEM-resident
        in_specs.append(pl.BlockSpec(bp.shape, lambda i: (0, 0)))   # biases:  VMEM-resident
        args.extend([wp, bp])
    out_specs = pl.BlockSpec((tile_b, dims_pad[-1]), lambda i: (i, 0))

    # ---- explicit VMEM budget (important on v7x's 64 MiB physical / 32 MiB default scoped) ----
    resident = sum(w.size * 2 for w in w_pad) + sum(b.size * 4 for b in b_pad)
    stream = 2 * tile_b * dims_pad[0] * 4 + 2 * tile_b * dims_pad[-1] * 4   # double-buffered x/out tiles
    live_h = 2 * tile_b * max(dims_pad) * 4                                 # live intermediates headroom
    vmem_limit = int(min(100 * (1 << 20), max(32 * (1 << 20), 2 * (resident + stream + live_h))))

    flops = 2 * sum(batch_pad * dims_pad[i] * dims_pad[i + 1] for i in range(num_layers))
    transcendentals = batch_pad * dims_pad[-1]
    bytes_accessed = (x_pad.size * 4
                      + sum(w.size * 2 for w in w_pad)
                      + sum(b.size * 4 for b in b_pad)
                      + batch_pad * dims_pad[-1] * 4)

    out_pad = pl.pallas_call(
        _make_mlp_kernel(num_layers, n_out),
        out_shape=jax.ShapeDtypeStruct((batch_pad, dims_pad[-1]), jnp.float32),
        grid=grid,
        in_specs=in_specs,
        out_specs=out_specs,
        compiler_params=pltpu.CompilerParams(
            dimension_semantics=("parallel",),        # v7x: shard batch tiles across both TCs
            vmem_limit_bytes=vmem_limit,
        ),
        cost_estimate=pl.CostEstimate(
            flops=flops, transcendentals=transcendentals, bytes_accessed=bytes_accessed),
        interpret=interpret,
    )(*args)

    return out_pad[:batch, :n_out]


def init_params(key, layers):
    """Deterministic parameter init mimicking nn.Linear (weight stored (out, in), then transposed)."""
    weights_t, biases = [], []
    for i in range(len(layers) - 1):
        fan_in, fan_out = layers[i], layers[i + 1]
        key, wk, bk = jax.random.split(key, 3)
        bound = 1.0 / jnp.sqrt(jnp.asarray(fan_in, jnp.float32))
        w = jax.random.uniform(wk, (fan_out, fan_in), jnp.float32, -bound, bound)
        b = jax.random.uniform(bk, (fan_out,), jnp.float32, -bound, bound)
        weights_t.append(jnp.transpose(w))        # (in, out) for x @ W
        biases.append(b.reshape(1, fan_out))      # 2-D / lane-friendly
    return weights_t, biases


def reference_forward_f32(x, weights, biases):
    h = x
    for i in range(len(weights) - 1):
        h = jnp.maximum(h @ weights[i] + biases[i], 0.0)
    h = h @ weights[-1] + biases[-1]
    return jax.nn.softmax(h, axis=1)


def reference_forward_bf16(x, weights, biases):
    """Mirrors the kernel numerics: bf16 matmul operands, f32 accumulation / softmax."""
    h = x.astype(jnp.float32)
    for i in range(len(weights)):
        acc = jnp.dot(h.astype(jnp.bfloat16), weights[i].astype(jnp.bfloat16),
                      preferred_element_type=jnp.float32) + biases[i]
        h = jnp.maximum(acc, 0.0) if i < len(weights) - 1 else acc
    return jax.nn.softmax(h, axis=1)


if __name__ == "__main__":
    # layers = [n_input, hidden, hidden, n_output]
    layers = [16, 32, 32, 8]
    batch = 4

    key = jax.random.PRNGKey(0)
    key, xk = jax.random.split(key)
    x = jax.random.normal(xk, (batch, layers[0]), jnp.float32)

    weights, biases = init_params(key, layers)

    out = variable_network_forward(x, weights, biases)
    out = jax.block_until_ready(out)

    assert out.shape == (batch, layers[-1])

    ref_bf16 = reference_forward_bf16(x, weights, biases)   # same-precision reference
    ref_f32 = reference_forward_f32(x, weights, biases)     # full-precision reference
    assert jnp.allclose(out, ref_bf16, atol=5e-3, rtol=5e-3), "mismatch vs bf16 JAX reference"
    assert jnp.allclose(out, ref_f32, atol=3e-2, rtol=3e-2), "mismatch vs f32 JAX reference"
    # rows of softmax output must sum to ~1 (approx reciprocal leaves tiny slack)
    assert jnp.allclose(jnp.sum(out, axis=1), jnp.ones((batch,)), atol=1e-2)

    print("KERNEL_OK")
</pallas_src>

<mosaic_0001>
module attributes {stable_mosaic.version = 11 : i64} {
  func.func @kernel(%arg0: i32, %arg1: memref<8x128xf32, #tpu.memory_space<vmem>>, %arg2: memref<128x128xbf16, #tpu.memory_space<vmem>>, %arg3: memref<1x128xf32, #tpu.memory_space<vmem>>, %arg4: memref<128x128xbf16, #tpu.memory_space<vmem>>, %arg5: memref<1x128xf32, #tpu.memory_space<vmem>>, %arg6: memref<128x128xbf16, #tpu.memory_space<vmem>>, %arg7: memref<1x128xf32, #tpu.memory_space<vmem>>, %arg8: memref<8x128xf32, #tpu.memory_space<vmem>>) attributes {dimension_semantics = [#tpu.dimension_semantics<parallel>], iteration_bounds = array<i64: 1>, scalar_prefetch = 0 : i64, scratch_operands = 0 : i64, tpu.core_type = #tpu.core_type<tc>, window_params = [{transform_indices = @transform_0, window_bounds = array<i64: 8, 128>}, {pipeline_mode = #tpu.pipeline_mode<synchronous>, transform_indices = @transform_1, window_bounds = array<i64: 128, 128>}, {pipeline_mode = #tpu.pipeline_mode<synchronous>, transform_indices = @transform_2, window_bounds = array<i64: 1, 128>}, {pipeline_mode = #tpu.pipeline_mode<synchronous>, transform_indices = @transform_3, window_bounds = array<i64: 128, 128>}, {pipeline_mode = #tpu.pipeline_mode<synchronous>, transform_indices = @transform_4, window_bounds = array<i64: 1, 128>}, {pipeline_mode = #tpu.pipeline_mode<synchronous>, transform_indices = @transform_5, window_bounds = array<i64: 128, 128>}, {pipeline_mode = #tpu.pipeline_mode<synchronous>, transform_indices = @transform_6, window_bounds = array<i64: 1, 128>}, {transform_indices = @transform_7, window_bounds = array<i64: 8, 128>}]} {
    %c0 = arith.constant 0 : index
    %c0_0 = arith.constant 0 : index
    %0 = vector.load %arg1[%c0, %c0_0] : memref<8x128xf32, #tpu.memory_space<vmem>>, vector<8x128xf32>
    %1 = arith.truncf %0 : vector<8x128xf32> to vector<8x128xbf16>
    %c0_1 = arith.constant 0 : index
    %c0_2 = arith.constant 0 : index
    %2 = vector.load %arg2[%c0_1, %c0_2] : memref<128x128xbf16, #tpu.memory_space<vmem>>, vector<128x128xbf16>
    %c0_3 = arith.constant 0 : index
    %c0_4 = arith.constant 0 : index
    %3 = vector.load %arg3[%c0_3, %c0_4] : memref<1x128xf32, #tpu.memory_space<vmem>>, vector<1x128xf32>
    %cst = arith.constant dense<0.000000e+00> : vector<8x128xf32>
    %4 = tpu.matmul %1, %2, %cst {dimension_numbers = #tpu.dot_dimension_numbers<[1], [0], [0], [1], [0, 0, 1, 1], [], []>} : vector<8x128xbf16>, vector<128x128xbf16>, vector<8x128xf32> -> vector<8x128xf32>
    %5 = vector.broadcast %3 : vector<1x128xf32> to vector<8x128xf32>
    %6 = arith.addf %4, %5 : vector<8x128xf32>
    %cst_5 = arith.constant 0.000000e+00 : f32
    %7 = vector.broadcast %cst_5 : f32 to vector<8x128xf32>
    %8 = arith.maximumf %6, %7 : vector<8x128xf32>
    %9 = arith.truncf %8 : vector<8x128xf32> to vector<8x128xbf16>
    %c0_6 = arith.constant 0 : index
    %c0_7 = arith.constant 0 : index
    %10 = vector.load %arg4[%c0_6, %c0_7] : memref<128x128xbf16, #tpu.memory_space<vmem>>, vector<128x128xbf16>
    %c0_8 = arith.constant 0 : index
    %c0_9 = arith.constant 0 : index
    %11 = vector.load %arg5[%c0_8, %c0_9] : memref<1x128xf32, #tpu.memory_space<vmem>>, vector<1x128xf32>
    %cst_10 = arith.constant dense<0.000000e+00> : vector<8x128xf32>
    %12 = tpu.matmul %9, %10, %cst_10 {dimension_numbers = #tpu.dot_dimension_numbers<[1], [0], [0], [1], [0, 0, 1, 1], [], []>} : vector<8x128xbf16>, vector<128x128xbf16>, vector<8x128xf32> -> vector<8x128xf32>
    %13 = vector.broadcast %11 : vector<1x128xf32> to vector<8x128xf32>
    %14 = arith.addf %12, %13 : vector<8x128xf32>
    %cst_11 = arith.constant 0.000000e+00 : f32
    %15 = vector.broadcast %cst_11 : f32 to vector<8x128xf32>
    %16 = arith.maximumf %14, %15 : vector<8x128xf32>
    %17 = arith.truncf %16 : vector<8x128xf32> to vector<8x128xbf16>
    %c0_12 = arith.constant 0 : index
    %c0_13 = arith.constant 0 : index
    %18 = vector.load %arg6[%c0_12, %c0_13] : memref<128x128xbf16, #tpu.memory_space<vmem>>, vector<128x128xbf16>
    %c0_14 = arith.constant 0 : index
    %c0_15 = arith.constant 0 : index
    %19 = vector.load %arg7[%c0_14, %c0_15] : memref<1x128xf32, #tpu.memory_space<vmem>>, vector<1x128xf32>
    %cst_16 = arith.constant dense<0.000000e+00> : vector<8x128xf32>
    %20 = tpu.matmul %17, %18, %cst_16 {dimension_numbers = #tpu.dot_dimension_numbers<[1], [0], [0], [1], [0, 0, 1, 1], [], []>} : vector<8x128xbf16>, vector<128x128xbf16>, vector<8x128xf32> -> vector<8x128xf32>
    %21 = vector.broadcast %19 : vector<1x128xf32> to vector<8x128xf32>
    %22 = arith.addf %20, %21 : vector<8x128xf32>
    %23 = tpu.iota {dimensions = array<i32: 1>} : vector<8x128xi32>
    %c8_i32 = arith.constant 8 : i32
    %24 = vector.broadcast %c8_i32 : i32 to vector<8x128xi32>
    %25 = arith.cmpi slt, %23, %24 : vector<8x128xi32>
    %cst_17 = arith.constant 0xFF800000 : f32
    %26 = vector.broadcast %cst_17 : f32 to vector<8x128xf32>
    %27 = arith.select %25, %22, %26 : vector<8x128xi1>, vector<8x128xf32>
    %cst_18 = arith.constant dense<0xFF800000> : vector<8xf32>
    %28 = vector.multi_reduction <maximumf>, %27, %cst_18 [1] : vector<8x128xf32> to vector<8xf32>
    %29 = vector.shape_cast %28 : vector<8xf32> to vector<8x1xf32>
    %30 = vector.broadcast %29 : vector<8x1xf32> to vector<8x128xf32>
    %31 = arith.subf %27, %30 : vector<8x128xf32>
    %32 = math.exp %31 : vector<8x128xf32>
    %cst_19 = arith.constant dense<0.000000e+00> : vector<8xf32>
    %33 = vector.multi_reduction <add>, %32, %cst_19 [1] : vector<8x128xf32> to vector<8xf32>
    %34 = vector.shape_cast %33 : vector<8xf32> to vector<8x1xf32>
    %35 = tpu.reciprocal %34 {approx = true} : vector<8x1xf32> -> vector<8x1xf32>
    %36 = vector.broadcast %35 : vector<8x1xf32> to vector<8x128xf32>
    %37 = arith.mulf %32, %36 : vector<8x128xf32>
    %c0_20 = arith.constant 0 : index
    %c0_21 = arith.constant 0 : index
    %38 = vector.load %arg8[%c0_20, %c0_21] : memref<8x128xf32, #tpu.memory_space<vmem>>, vector<8x128xf32>
    tpu.vector_store %arg8[%c0_20, %c0_21], %37 {strides = array<i32>} : memref<8x128xf32, #tpu.memory_space<vmem>>, vector<8x128xf32>,
    return
  }
  func.func @transform_0(%arg0: i32) -> (i32, i32) {
    %c0_i32 = arith.constant 0 : i32
    %c0_i32_0 = arith.constant 0 : i32
    return %arg0, %c0_i32 : i32, i32
  }
  func.func @transform_1(%arg0: i32) -> (i32, i32) {
    %c0_i32 = arith.constant 0 : i32
    %c0_i32_0 = arith.constant 0 : i32
    %c0_i32_1 = arith.constant 0 : i32
    return %c0_i32, %c0_i32_0 : i32, i32
  }
  func.func @transform_2(%arg0: i32) -> (i32, i32) {
    %c0_i32 = arith.constant 0 : i32
    %c0_i32_0 = arith.constant 0 : i32
    %c0_i32_1 = arith.constant 0 : i32
    return %c0_i32, %c0_i32_0 : i32, i32
  }
  func.func @transform_3(%arg0: i32) -> (i32, i32) {
    %c0_i32 = arith.constant 0 : i32
    %c0_i32_0 = arith.constant 0 : i32
    %c0_i32_1 = arith.constant 0 : i32
    return %c0_i32, %c0_i32_0 : i32, i32
  }
  func.func @transform_4(%arg0: i32) -> (i32, i32) {
    %c0_i32 = arith.constant 0 : i32
    %c0_i32_0 = arith.constant 0 : i32
    %c0_i32_1 = arith.constant 0 : i32
    return %c0_i32, %c0_i32_0 : i32, i32
  }
  func.func @transform_5(%arg0: i32) -> (i32, i32) {
    %c0_i32 = arith.constant 0 : i32
    %c0_i32_0 = arith.constant 0 : i32
    %c0_i32_1 = arith.constant 0 : i32
    return %c0_i32, %c0_i32_0 : i32, i32
  }
  func.func @transform_6(%arg0: i32) -> (i32, i32) {
    %c0_i32 = arith.constant 0 : i32
    %c0_i32_0 = arith.constant 0 : i32
    %c0_i32_1 = arith.constant 0 : i32
    return %c0_i32, %c0_i32_0 : i32, i32
  }
  func.func @transform_7(%arg0: i32) -> (i32, i32) {
    %c0_i32 = arith.constant 0 : i32
    %c0_i32_0 = arith.constant 0 : i32
    return %arg0, %c0_i32 : i32, i32
  }
}

</mosaic_0001>

<bundles_post_ra>
// kernel: tpu_custom_call.1
= control target key start
LH: loop header
LB: loop body
LE: loop exit
PB: predicated region body
PF: predicated region fallthrough
CT: control target
= control target key end

     0   :  { %12 = vsyncpa [#allocation3], 0  ;;  %s703_s0 = inlined_call_operand.hbm [shape: f32[8,128], index: 0, kind: input, shape index: {}]   ;;  %s704_s1 = inlined_call_operand.hbm [shape: bf16[128,128], index: 1, kind: input, shape index: {}]   ;;  %s705_s2 = inlined_call_operand.vmem [shape: f32[1,128], index: 2, kind: input, shape index: {}]   ;;  %s706_s3 = inlined_call_operand.hbm [shape: bf16[128,128], index: 3, kind: input, shape index: {}]   ;;  %s707_s4 = inlined_call_operand.vmem [shape: f32[1,128], index: 4, kind: input, shape index: {}]   ;;  %s708_s5 = inlined_call_operand.hbm [shape: bf16[128,128], index: 5, kind: input, shape index: {}]   ;;  %s709_s6 = inlined_call_operand.vmem [shape: f32[1,128], index: 6, kind: input, shape index: {}]   ;;  %s710_s7 = inlined_call_operand.hbm [shape: f32[8,128], index: 7, kind: output, shape index: {}]  }
   0x1   :  { %13 = vsyncpa [#allocation6], 0 }
   0x2   :  { %14 = vsyncpa [#allocation9], 0  ;;  %s31_s26 = sshll.u32 %s704_s1, 4  ;;  %s32_s26 = int_to_ptr.hbm [resolvable:$true] %s31_s26 }
   0x3   :  { %15 = vsyncpa [#allocation4], 0  ;;  %s632_s27 = smov [#allocation5]   ;;  %s21_s8 = sshll.u32 %s703_s0, 4  ;;  %s22_s8 = int_to_ptr.hbm [resolvable:$true] %s21_s8 }
   0x4   :  { %s33_s28 = sshll.u32 %s632_s27, 4  ;;  %s633_s9 = smov 64   ;;  %s34_s28 = int_to_ptr.vmem [resolvable:$true] %s33_s28 }
   0x5   :  { %s634_s10 = smov 4   ;;  %s635_s11 = smov [#allocation2]  }
   0x6   :  { %39 = dma.hbm_to_vmem [thread:$0]  %s32_s26, 1024, %s34_s28, [#allocation6], %s633_s9, %s633_s9, %s634_s10  }
   0x7   :  { %s23_s12 = sshll.u32 %s635_s11, 4  ;;  %s46_s15 = sshll.u32 %s706_s3, 4  ;;  %s24_s12 = int_to_ptr.vmem [resolvable:$true] %s23_s12  ;;  %s47_s15 = int_to_ptr.hbm [resolvable:$true] %s46_s15 }
   0x8   :  { %26 = dma.hbm_to_vmem [thread:$0]  %s22_s8, 128, %s24_s12, [#allocation3]  }
   0x9   :  { %s61_s17 = sshll.u32 %s708_s5, 4  ;;  %s636_s18 = smov [#allocation7]   ;;  %s62_s17 = int_to_ptr.hbm [resolvable:$true] %s61_s17 }
   0xa   :  { %s48_s19 = sshll.u32 %s636_s18, 4  ;;  %s637_s0 = smov [#allocation8]   ;;  %s49_s19 = int_to_ptr.vmem [resolvable:$true] %s48_s19 }
   0xb   :  { %54 = dma.hbm_to_vmem [thread:$0]  %s47_s15, 1024, %s49_s19, [#allocation6], %s633_s9, %s633_s9, %s634_s10  }
   0xc   :  { %s63_s20 = sshll.u32 %s637_s0, 4  ;;  %s64_s20 = int_to_ptr.vmem [resolvable:$true] %s63_s20 }
   0xd   :  { %69 = dma.hbm_to_vmem [thread:$0]  %s62_s17, 1024, %s64_s20, [#allocation9], %s633_s9, %s633_s9, %s634_s10  }
   0xe   :  { %624 = dma.done.wait [#allocation3], 128  }
   0xf   :  { %625 = vsyncadd [#allocation3], 4294967168 }
  0x10   :  { %626 = dma.done.wait [#allocation6], 2048  }
  0x11   :  { %627 = vsyncadd [#allocation6], 4294965248 }
  0x12   :  { %628 = dma.done.wait [#allocation9], 1024  }
  0x13   :  { %629 = vsyncadd [#allocation9], 4294966272  ;;  %v473_v0 = vld [vmem:[#allocation5 + $0x38] sm:$0xff]  ;;  %v472_v1 = vld [vmem:[#allocation5 + $0x30] sm:$0xff]  ;;  %v337_v38 = vlaneseq }
  0x14   :  { %158 = vmatpush.bf16.msra.mxu0 %v473_v0  ;;  %v481_v2 = vld [vmem:[#allocation7 + $0x38] sm:$0xff]  ;;  %v480_v3 = vld [vmem:[#allocation7 + $0x30] sm:$0xff]  ;;  %v471_v4 = vld [vmem:[#allocation5 + $0x28] sm:$0xff] }
  0x15   :  { %241 = vmatpush.bf16.msra.mxu1 %v481_v2  ;;  %v479_v5 = vld [vmem:[#allocation7 + $0x28] sm:$0xff]  ;;  %v470_v6 = vld [vmem:[#allocation5 + $0x20] sm:$0xff]  ;;  %v469_v8 = vld [vmem:[#allocation5 + $0x18] sm:$0xff]  ;;  %v338_v39 = vand.u32 127, %v337_v38 }
  0x16   :  { %v478_v7 = vld [vmem:[#allocation7 + $0x20] sm:$0xff]  ;;  %v477_v9 = vld [vmem:[#allocation7 + $0x18] sm:$0xff]  ;;  %v468_v10 = vld [vmem:[#allocation5 + $0x10] sm:$0xff] }
  0x17   :  { %v476_v11 = vld [vmem:[#allocation7 + $0x10] sm:$0xff]  ;;  %v467_v12 = vld [vmem:[#allocation5 + $0x8] sm:$0xff]  ;;  %v466_v13 = vld [vmem:[#allocation5] sm:$0xff]  ;;  %vm339_vm0 = vcmp.lt.s32.totalorder %v338_v39, 8 }
  0x18   :  { %159 = vmatpush.bf16.msra.mxu0 %v472_v1  ;;  %v88_v14 = vld [vmem:[#allocation2] sm:$0xff]  ;;  %v475_v16 = vld [vmem:[#allocation7 + $0x8] sm:$0xff]  ;;  %v474_v17 = vld [vmem:[#allocation7] sm:$0xff] }
  0x19   :  { %242 = vmatpush.bf16.msra.mxu1 %v480_v3  ;;  %v89_v15 = vpack.c.bf16 %v88_v14, %v88_v14  ;;  %v489_v18 = vld [vmem:[#allocation8 + $0x38] sm:$0xff]  ;;  %v488_v19 = vld [vmem:[#allocation8 + $0x30] sm:$0xff]  ;;  %v487_v20 = vld [vmem:[#allocation8 + $0x28] sm:$0xff] }
  0x1a   :  { %324 = vmatpush.bf16.msra.mxu2 %v489_v18  ;;  %v486_v21 = vld [vmem:[#allocation8 + $0x20] sm:$0xff]  ;;  %v485_v22 = vld [vmem:[#allocation8 + $0x18] sm:$0xff]  ;;  %v484_v23 = vld [vmem:[#allocation8 + $0x10] sm:$0xff] }
  0x1b   :  { %v497_v24 = vld [vmem:[%s705_s2] ss:$0 sm:$0xff]  ;;  %v483_v30 = vld [vmem:[#allocation8 + $0x8] sm:$0xff]  ;;  %v482_v31 = vld [vmem:[#allocation8] sm:$0xff] }
  0x1c   :  { %160 = vmatpush.bf16.msra.mxu0 %v471_v4  ;;  %v498_v32 = vld [vmem:[%s707_s4] ss:$0 sm:$0xff]  ;;  %s638_s4 = smov [#allocation10]  }
  0x1d   :  { %243 = vmatpush.bf16.msra.mxu1 %v479_v5  ;;  %v499_v40 = vld [vmem:[%s709_s6] ss:$0 sm:$0xff]  ;;  %s356_s24 = sshll.u32 %s638_s4, 4  ;;  %s358_s6 = sshll.u32 %s710_s7, 4  ;;  %s357_s24 = int_to_ptr.vmem [resolvable:$true] %s356_s24  ;;  %s359_s6 = int_to_ptr.hbm [resolvable:$true] %s358_s6 }
  0x1e   :  { %325 = vmatpush.bf16.msra.mxu2 %v488_v19 }
  0x20   :  { %161 = vmatpush.bf16.msra.mxu0 %v470_v6 }
  0x21   :  { %244 = vmatpush.bf16.msra.mxu1 %v478_v7 }
  0x22   :  { %326 = vmatpush.bf16.msra.mxu2 %v487_v20 }
  0x24   :  { %162 = vmatpush.bf16.msra.mxu0 %v469_v8 }
  0x25   :  { %245 = vmatpush.bf16.msra.mxu1 %v477_v9 }
  0x26   :  { %327 = vmatpush.bf16.msra.mxu2 %v486_v21 }
  0x28   :  { %163 = vmatpush.bf16.msra.mxu0 %v468_v10 }
  0x29   :  { %246 = vmatpush.bf16.msra.mxu1 %v476_v11 }
  0x2a   :  { %328 = vmatpush.bf16.msra.mxu2 %v485_v22 }
  0x2c   :  { %164 = vmatpush.bf16.msra.mxu0 %v467_v12 }
  0x2d   :  { %247 = vmatpush.bf16.msra.mxu1 %v475_v16 }
  0x2e   :  { %329 = vmatpush.bf16.msra.mxu2 %v484_v23 }
  0x30   :  { %165 = vmatpush.bf16.msra.mxu0 %v466_v13 }
  0x31   :  { %248 = vmatpush.bf16.msra.mxu1 %v474_v17 }
  0x32   :  { %330 = vmatpush.bf16.msra.mxu2 %v483_v30 }
  0x33   :  { %166 = vmatmul.bf16.vlgmr.msra.gmra.mxu0 %v89_v15 }
  0x36   :  { %331 = vmatpush.bf16.msra.mxu2 %v482_v31 }
  0xb0   :  { %v167_v25 = vpop.f32.mrf.mxu0 }
  0xb1   :  { %v168_v26 = vadd.f32 %v497_v24, %v167_v25 }
  0xb3   :  { %v171_v27 = vmax.f32 %v168_v26, 0.0 }
  0xb5   :  { %v172_v28 = vpack.c.bf16 %v171_v27, %v171_v27 }
  0xb7   :  { %249 = vmatmul.bf16.vlgmr.msra.gmra.mxu1 %v172_v28 }
  0xb8   :  { %v169_v29 = vpop.f32.mrf.mxu0 }
 0x134   :  { %v250_v33 = vpop.f32.mrf.mxu1 }
 0x135   :  { %v251_v34 = vadd.f32 %v498_v32, %v250_v33 }
 0x137   :  { %v254_v35 = vmax.f32 %v251_v34, 0.0 }
 0x139   :  { %v255_v36 = vpack.c.bf16 %v254_v35, %v254_v35 }
 0x13b   :  { %332 = vmatmul.bf16.vlgmr.msra.gmra.mxu2 %v255_v36 }
 0x13c   :  { %v252_v37 = vpop.f32.mrf.mxu1 }
 0x1be   :  { %v333_v41 = vpop.f32.mrf.mxu2 }
 0x1bf   :  { %v334_v42 = vadd.f32 %v499_v40, %v333_v41 }
 0x1c1   :  { %v340_v43 = vsel %vm339_vm0, %v334_v42, -inf }
 0x1c2   :  { %341 = vmax.xlane.f32.xlu0 %v340_v43 }
 0x1c6   :  { %v335_v44 = vpop.f32.mrf.mxu2 }
 0x235   :  { %v342_v45 = vpop.xlane.xlu0 %341 }
 0x236   :  { %v343_v46 = vsub.f32 %v340_v43, %v342_v45 }
 0x238   :  { %v344_v47 = vmul.f32 1.442695, %v343_v46 }
 0x23a   :  { %500 = vpow2.f32 %v344_v47 }
 0x240   :  { %v501_v48 = vpop.eup %500 }
 0x241   :  { %346 = vadd.xlane.f32.xlu0 %v501_v48 }
 0x2b4   :  { %v347_v49 = vpop.xlane.xlu0 %346 }
 0x2b5   :  { %502 = vrcp.f32 %v347_v49 }
 0x2bb   :  { %v503_v50 = vpop.eup %502 }
 0x2bc   :  { %v349_v51 = vmul.f32 %v503_v50, %v501_v48 }
 0x2be   :  { %350 = vst [vmem:[#allocation10] sm:$0xff] %v349_v51 }
 0x2bf   :  { %361 = dma.vmem_to_hbm [thread:$0]  %s357_s24, 128, %s359_s6, [#allocation4]  }
 0x2c0   :  { %630 = dma.done.wait [#allocation4], 128  }
 0x2c1   :  { %631 = vsyncadd [#allocation4], 4294967168 }
 0x2c2   :  { %366 = vsyncpa [#allocation3], 1 }
 0x2c3   :  { %367 = vsyncpa [#allocation6], 1 }
 0x2c4   :  { %368 = vsyncpa [#allocation9], 1 }
 0x2c5   :  { %369 = vsyncpa [#allocation4], 1 }

</bundles_post_ra>
